<compile_context>
chip_gen: v6e
topology: v6e:2x2x1
jax: 0.10.0
libtpu: 0.0.40
codegen_flags: <defaults>
</compile_context>

<pallas_src>
import functools

import jax
import jax.numpy as jnp
from jax.experimental import pallas as pl
from jax.experimental.pallas import tpu as pltpu


_LANES = 128
_BATCH_BLOCK_BYTES = 2 * 1024 * 1024     # target per-input block, batch path


def _default_tiling():
    """Pick (tile_rows, vmem_limit_bytes) from the local chip's VMEM size."""
    try:
        vmem = pltpu.get_tpu_info().vmem_capacity_bytes
    except Exception:  # unknown chip / query unavailable -> conservative
        vmem = 64 * 1024 * 1024
    if vmem >= 96 * 1024 * 1024:          # v5e / v6e: 128 MiB physical VMEM
        return 16384, 64 * 1024 * 1024
    return 8192, 40 * 1024 * 1024         # v7x (64 MiB physical) and fallback


_DEFAULT_TILE_ROWS, _DEFAULT_VMEM_LIMIT = _default_tiling()


# ---------------------------------------------------------------------------
# Small-D path: one grid step handles a (tile_b, D_pad) block of whole samples.
# ---------------------------------------------------------------------------
def _dice_batch_kernel(p_ref, t_ref, o_ref, *, smooth):
    p = p_ref[...].astype(jnp.float32)                            # (tile_b, d_pad)
    t = t_ref[...].astype(jnp.float32)
    num = jnp.sum(p * t, axis=1, keepdims=True) + smooth          # (tile_b, 1)
    den = jnp.sum(p * p + t * t, axis=1, keepdims=True) + smooth  # (tile_b, 1)
    loss = 1.0 - num / den
    o_ref[...] = jnp.broadcast_to(loss, o_ref.shape).astype(o_ref.dtype)


def _dice_batch(p2, t2, *, smooth, granularity, vmem_limit):
    n, d_pad = p2.shape
    cap_b = max(granularity,
                (_BATCH_BLOCK_BYTES // (d_pad * 4) // granularity) * granularity)
    tile_b = n if n <= cap_b else cap_b

    out = pl.pallas_call(
        functools.partial(_dice_batch_kernel, smooth=smooth),
        out_shape=jax.ShapeDtypeStruct((n, _LANES), jnp.float32),
        grid_spec=pltpu.PrefetchScalarGridSpec(
            num_scalar_prefetch=0,
            grid=(pl.cdiv(n, tile_b),),
            in_specs=[
                pl.BlockSpec((tile_b, d_pad), lambda i: (i, 0)),
                pl.BlockSpec((tile_b, d_pad), lambda i: (i, 0)),
            ],
            out_specs=pl.BlockSpec((tile_b, _LANES), lambda i: (i, 0)),
        ),
        compiler_params=pltpu.CompilerParams(
            dimension_semantics=("parallel",),
            vmem_limit_bytes=vmem_limit,
        ),
    )(p2, t2)

    return jnp.mean(out[:, 0])


# ---------------------------------------------------------------------------
# Large-D path: row-tiled reduction with (8, 128) partial accumulators.
# ---------------------------------------------------------------------------
def _pick_tile_r(rows, tile_rows, g):
    """Largest multiple-of-g row tile; prefers a divisor of `rows` (no mask)."""
    if rows <= tile_rows:
        return max(g, (rows // g) * g)
    cap = max(g, (tile_rows // g) * g)
    lo = max(g, ((cap // 2) // g) * g)
    for t in range(cap, lo - 1, -g):
        if rows % t == 0:
            return t
    return cap


def _dice_rows_kernel(p_ref, t_ref, num_ref, den_ref, *,
                      rows, tile_r, tiles_per_split, total_tiles, needs_mask):
    r = pl.program_id(2)

    @pl.when(r == 0)
    def _():
        num_ref[...] = jnp.zeros_like(num_ref)
        den_ref[...] = jnp.zeros_like(den_ref)

    p = p_ref[0].astype(jnp.float32)               # (tile_r, 128)
    t = t_ref[0].astype(jnp.float32)
    pt = p * t
    sq = p * p + t * t

    def _accumulate(ptv, sqv):
        # Fold (tile_r, 128) -> (8, 128) with pure VPU vreg adds (no XLU) and
        # accumulate straight into the vreg-sized output partials.
        num_ref[0, 0] += ptv.reshape(-1, 8, _LANES).sum(axis=0)
        den_ref[0, 0] += sqv.reshape(-1, 8, _LANES).sum(axis=0)

    if needs_mask:
        gt = pl.program_id(1) * tiles_per_split + r   # global row-tile index
        is_edge = gt == total_tiles - 1

        @pl.when(jnp.logical_not(is_edge))
        def _():
            _accumulate(pt, sq)                       # fast path, no mask ops

        @pl.when(is_edge)
        def _():
            row_ids = gt * tile_r + jax.lax.broadcasted_iota(
                jnp.int32, (tile_r, _LANES), 0)
            valid = row_ids < rows
            _accumulate(jnp.where(valid, pt, 0.0), jnp.where(valid, sq, 0.0))
    else:
        _accumulate(pt, sq)


def _dice_rows(p3, t3, *, smooth, tile_rows, granularity, vmem_limit):
    n, rows, _ = p3.shape
    tile_r = _pick_tile_r(rows, tile_rows, granularity)
    total_tiles = pl.cdiv(rows, tile_r)
    needs_mask = (rows % tile_r) != 0
    # With a single sample the batch axis cannot feed both TensorCores of a
    # v7x megacore; split the reduction into two "parallel" halves instead.
    n_split = 2 if (n == 1 and total_tiles >= 2 and total_tiles % 2 == 0) else 1
    tiles_per_split = total_tiles // n_split

    kernel = functools.partial(
        _dice_rows_kernel, rows=rows, tile_r=tile_r,
        tiles_per_split=tiles_per_split, total_tiles=total_tiles,
        needs_mask=needs_mask)

    num_p, den_p = pl.pallas_call(
        kernel,
        out_shape=(
            jax.ShapeDtypeStruct((n, n_split, 8, _LANES), jnp.float32),
            jax.ShapeDtypeStruct((n, n_split, 8, _LANES), jnp.float32),
        ),
        grid_spec=pltpu.PrefetchScalarGridSpec(
            num_scalar_prefetch=0,
            grid=(n, n_split, tiles_per_split),
            in_specs=[
                pl.BlockSpec((1, tile_r, _LANES),
                             lambda b, s, r: (b, s * tiles_per_split + r, 0)),
                pl.BlockSpec((1, tile_r, _LANES),
                             lambda b, s, r: (b, s * tiles_per_split + r, 0)),
            ],
            out_specs=[
                pl.BlockSpec((1, 1, 8, _LANES), lambda b, s, r: (b, s, 0, 0)),
                pl.BlockSpec((1, 1, 8, _LANES), lambda b, s, r: (b, s, 0, 0)),
            ],
        ),
        compiler_params=pltpu.CompilerParams(
            dimension_semantics=("parallel", "parallel", "arbitrary"),
            vmem_limit_bytes=vmem_limit,
        ),
    )(p3, t3)

    num = num_p.sum(axis=(1, 2, 3)) + smooth          # (n,) tiny JAX epilogue
    den = den_p.sum(axis=(1, 2, 3)) + smooth
    return jnp.mean(1.0 - num / den)


# ---------------------------------------------------------------------------
# Public wrapper (matches torch oneclass_DiceLoss.forward semantics).
# ---------------------------------------------------------------------------
@functools.partial(
    jax.jit,
    static_argnames=("smooth", "tile_rows", "batch_bytes_max", "vmem_limit_bytes"))
def oneclass_dice_loss(predict, target, smooth=1.0, tile_rows=None,
                       batch_bytes_max=256 * 1024, vmem_limit_bytes=None):
    assert predict.shape == target.shape, "predict & target shape don't match"
    n = predict.shape[0]
    p2 = predict.reshape(n, -1)
    t2 = target.reshape(n, -1)
    d = p2.shape[1]

    if tile_rows is None:
        tile_rows = _DEFAULT_TILE_ROWS
    if vmem_limit_bytes is None:
        vmem_limit_bytes = _DEFAULT_VMEM_LIMIT

    # Sublane granularity for packed dtypes (f32 -> 8, bf16 -> 16, int8 -> 32);
    # narrow inputs are accepted natively (in-kernel f32 accumulation).
    itemsize = min(jnp.dtype(predict.dtype).itemsize,
                   jnp.dtype(target.dtype).itemsize, 4)
    g = max(8, 32 // itemsize)

    # Pad the feature dim to a multiple of 128 lanes only when needed (zeros
    # contribute 0 to both num and den, so this is exact).  When D % 128 == 0
    # the reshapes below are metadata-only under jit.
    # TODO(synk): a manual-DMA (memory_space=pl.ANY) path could avoid this pad
    # copy for the rare D % 128 != 0 case.
    d_pad = pl.cdiv(d, _LANES) * _LANES
    if d_pad != d:
        p2 = jnp.pad(p2, ((0, 0), (0, d_pad - d)))
        t2 = jnp.pad(t2, ((0, 0), (0, d_pad - d)))
    rows = d_pad // _LANES

    if rows < g or rows * _LANES * 4 <= batch_bytes_max:
        return _dice_batch(p2, t2, smooth=float(smooth), granularity=g,
                           vmem_limit=vmem_limit_bytes)

    p3 = p2.reshape(n, rows, _LANES)
    t3 = t2.reshape(n, rows, _LANES)
    return _dice_rows(p3, t3, smooth=float(smooth), tile_rows=tile_rows,
                      granularity=g, vmem_limit=vmem_limit_bytes)


def _reference(predict, target, smooth=1.0):
    n = predict.shape[0]
    p = predict.reshape(n, -1).astype(jnp.float32)
    t = target.reshape(n, -1).astype(jnp.float32)
    num = jnp.sum(p * t, axis=1) + smooth
    den = jnp.sum(p * p + t * t, axis=1) + smooth
    return jnp.mean(1.0 - num / den)


if __name__ == "__main__":
    root = jax.random.PRNGKey(0)

    def _make(shape, key):
        kp, kt = jax.random.split(key)
        predict = jax.nn.sigmoid(jax.random.normal(kp, shape, dtype=jnp.float32))
        target = (jax.random.uniform(kt, shape) > 0.5).astype(jnp.float32)
        return predict, target

    cases = [
        # Default kwargs exercise the small-D batch path; the forced-small-tile
        # cases exercise the row path (multi-tile, remainder mask, n==1 split).
        ((2, 4, 16, 16), {}),                                          # batch path
        ((3, 3, 7, 5), {}),                                            # D % 128 != 0
        ((2, 3, 31, 64), dict(batch_bytes_max=0, tile_rows=16)),       # rows + mask
        ((1, 30, 16, 16), dict(batch_bytes_max=0, tile_rows=16)),      # split + mask
        ((2, 2, 32, 32), dict(batch_bytes_max=0, tile_rows=8)),        # rows, no mask
    ]

    keys = jax.random.split(root, len(cases))
    for (shape, kwargs), key in zip(cases, keys):
        predict, target = _make(shape, key)
        loss = jax.block_until_ready(
            oneclass_dice_loss(predict, target, smooth=1.0, **kwargs))
        ref = jax.block_until_ready(_reference(predict, target, smooth=1.0))
        assert jnp.allclose(loss, ref, atol=1e-5, rtol=1e-5), (shape, loss, ref)

    print("KERNEL_OK")
</pallas_src>

<mosaic_0001>
module attributes {stable_mosaic.version = 11 : i64} {
  func.func @_dice_batch_kernel(%arg0: i32, %arg1: memref<2x1024xf32, #tpu.memory_space<vmem>>, %arg2: memref<2x1024xf32, #tpu.memory_space<vmem>>, %arg3: memref<2x128xf32, #tpu.memory_space<vmem>>) attributes {dimension_semantics = [#tpu.dimension_semantics<parallel>], iteration_bounds = array<i64: 1>, scalar_prefetch = 0 : i64, scratch_operands = 0 : i64, tpu.core_type = #tpu.core_type<tc>, window_params = [{transform_indices = @transform_0, window_bounds = array<i64: 2, 1024>}, {transform_indices = @transform_1, window_bounds = array<i64: 2, 1024>}, {transform_indices = @transform_2, window_bounds = array<i64: 2, 128>}]} {
    %c0 = arith.constant 0 : index
    %c0_0 = arith.constant 0 : index
    %0 = vector.load %arg1[%c0, %c0_0] : memref<2x1024xf32, #tpu.memory_space<vmem>>, vector<2x1024xf32>
    %c0_1 = arith.constant 0 : index
    %c0_2 = arith.constant 0 : index
    %1 = vector.load %arg2[%c0_1, %c0_2] : memref<2x1024xf32, #tpu.memory_space<vmem>>, vector<2x1024xf32>
    %2 = arith.mulf %0, %1 : vector<2x1024xf32>
    %cst = arith.constant dense<0.000000e+00> : vector<2xf32>
    %3 = vector.multi_reduction <add>, %2, %cst [1] : vector<2x1024xf32> to vector<2xf32>
    %4 = vector.shape_cast %3 : vector<2xf32> to vector<2x1xf32>
    %cst_3 = arith.constant 1.000000e+00 : f32
    %5 = vector.broadcast %cst_3 : f32 to vector<2x1xf32>
    %6 = arith.addf %4, %5 : vector<2x1xf32>
    %7 = arith.mulf %0, %0 : vector<2x1024xf32>
    %8 = arith.mulf %1, %1 : vector<2x1024xf32>
    %9 = arith.addf %7, %8 : vector<2x1024xf32>
    %cst_4 = arith.constant dense<0.000000e+00> : vector<2xf32>
    %10 = vector.multi_reduction <add>, %9, %cst_4 [1] : vector<2x1024xf32> to vector<2xf32>
    %11 = vector.shape_cast %10 : vector<2xf32> to vector<2x1xf32>
    %cst_5 = arith.constant 1.000000e+00 : f32
    %12 = vector.broadcast %cst_5 : f32 to vector<2x1xf32>
    %13 = arith.addf %11, %12 : vector<2x1xf32>
    %14 = arith.divf %6, %13 : vector<2x1xf32>
    %cst_6 = arith.constant 1.000000e+00 : f32
    %15 = vector.broadcast %cst_6 : f32 to vector<2x1xf32>
    %16 = arith.subf %15, %14 : vector<2x1xf32>
    %17 = vector.shape_cast %16 : vector<2x1xf32> to vector<2x1xf32>
    %18 = vector.broadcast %17 : vector<2x1xf32> to vector<2x128xf32>
    %c0_7 = arith.constant 0 : index
    %c0_8 = arith.constant 0 : index
    %19 = vector.load %arg3[%c0_7, %c0_8] : memref<2x128xf32, #tpu.memory_space<vmem>>, vector<2x128xf32>
    tpu.vector_store %arg3[%c0_7, %c0_8], %18 {strides = array<i32>} : memref<2x128xf32, #tpu.memory_space<vmem>>, vector<2x128xf32>,
    return
  }
  func.func @transform_0(%arg0: i32) -> (i32, i32) {
    %c0_i32 = arith.constant 0 : i32
    %c0_i32_0 = arith.constant 0 : i32
    return %arg0, %c0_i32 : i32, i32
  }
  func.func @transform_1(%arg0: i32) -> (i32, i32) {
    %c0_i32 = arith.constant 0 : i32
    %c0_i32_0 = arith.constant 0 : i32
    return %arg0, %c0_i32 : i32, i32
  }
  func.func @transform_2(%arg0: i32) -> (i32, i32) {
    %c0_i32 = arith.constant 0 : i32
    %c0_i32_0 = arith.constant 0 : i32
    return %arg0, %c0_i32 : i32, i32
  }
}

</mosaic_0001>

<bundles_post_ra>
// kernel: oneclass_dice_loss.1
= control target key start
LH: loop header
LB: loop body
LE: loop exit
PB: predicated region body
PF: predicated region fallthrough
CT: control target
= control target key end

     0   :  { %v23_v0 = vlaneseq  ;;  %v159_v4 = vmov 1983009808   ;;  %vm61_vm0 = vcmask 1041408   ;;  %s206_s0 = inlined_call_operand.vmem [shape: f32[2,1024], index: 0, kind: input, shape index: {}]   ;;  %s207_s1 = inlined_call_operand.vmem [shape: f32[2,1024], index: 1, kind: input, shape index: {}]   ;;  %s208_s2 = inlined_call_operand.vmem [shape: f32[2,128], index: 2, kind: output, shape index: {}]  }
   0x1   :  { %v11_v1 = vld [vmem:[%s206_s0] sm:$0xff]  ;;  %v12_v2 = vld [vmem:[%s206_s0 + $0x8] sm:$0xff]  ;;  %v21_v5 = vunpack.c.l.s4 %v159_v4 }
   0x2   :  { %v13_v3 = vld [vmem:[%s207_s1] sm:$0xff]  ;;  %v14_v6 = vld [vmem:[%s207_s1 + $0x8] sm:$0xff]  ;;  %v24_v7 = vshrl.u32 %v23_v0, 7  ;;  %v80_v8 = vmul.f32 %v11_v1, %v11_v1  ;;  %v81_v9 = vmul.f32 %v12_v2, %v12_v2 }
   0x3   :  { %v82_v10 = vmul.f32 %v13_v3, %v13_v3  ;;  %v22_v11 = vunpack.c.0.s8 %v21_v5  ;;  %v83_v12 = vmul.f32 %v14_v6, %v14_v6  ;;  %v15_v13 = vmul.f32 %v13_v3, %v11_v1 }
   0x4   :  { %v16_v20 = vmul.f32 %v14_v6, %v12_v2 }
   0x5   :  { %v84_v14 = vadd.f32 %v82_v10, %v80_v8  ;;  %v25_v15 = vsub.s32 %v22_v11, %v24_v7  ;;  %v85_v16 = vadd.f32 %v83_v12, %v81_v9  ;;  %v19_v17 = vcombine.high %v15_v13, %v15_v13 }
   0x6   :  { %v36_v32 = vcombine.high %v16_v20, %v16_v20 }
   0x7   :  { %v88_v18 = vcombine.high %v84_v14, %v84_v14  ;;  %v95_v19 = vrot.slane %v84_v14, %v25_v15  ;;  %v26_v21 = vrot.slane %v15_v13, %v25_v15  ;;  %v105_v23 = vcombine.high %v85_v16, %v85_v16 }
   0x8   :  { %v33_v24 = vrot.slane %v19_v17, %v25_v15  ;;  %v112_v26 = vrot.slane %v85_v16, %v25_v15  ;;  %v43_v33 = vrot.slane %v16_v20, %v25_v15  ;;  %v50_v45 = vrot.slane %v36_v32, %v25_v15 }
   0x9   :  { %v102_v22 = vrot.slane %v88_v18, %v25_v15  ;;  %v103_v25 = vcombine.high %v95_v19, %v95_v19  ;;  %v130_v27 = vsel %vm61_vm0, %v95_v19, 0.0  ;;  %v34_v29 = vcombine.high %v26_v21, %v26_v21 }
   0xa   :  { %v119_v34 = vrot.slane %v105_v23, %v25_v15  ;;  %v35_v36 = vcombine.high %v33_v24, %v33_v24  ;;  %v120_v37 = vcombine.high %v112_v26, %v112_v26  ;;  %v62_v39 = vsel %vm61_vm0, %v26_v21, 0.0 }
   0xb   :  { %v104_v28 = vcombine.high %v102_v22, %v102_v22  ;;  %v131_v30 = vsel %vm61_vm0, %v103_v25, 0.0  ;;  %v133_v31 = vsel %vm61_vm0, %v102_v22, 0.0  ;;  %v63_v40 = vsel %vm61_vm0, %v34_v29, 0.0 }
   0xc   :  { %v132_v35 = vadd.f32 %v131_v30, %v130_v27  ;;  %v64_v42 = vadd.f32 %v63_v40, %v62_v39  ;;  %v65_v43 = vsel %vm61_vm0, %v33_v24, 0.0  ;;  %v137_v44 = vsel %vm61_vm0, %v112_v26, 0.0 }
   0xd   :  { %v135_v38 = vsel %vm61_vm0, %v104_v28, 0.0  ;;  %v51_v46 = vcombine.high %v43_v33, %v43_v33  ;;  %v67_v47 = vsel %vm61_vm0, %v35_v36, 0.0  ;;  %v121_v50 = vcombine.high %v119_v34, %v119_v34 }
   0xe   :  { %v134_v41 = vadd.f32 %v133_v31, %v132_v35  ;;  %v66_v49 = vadd.f32 %v65_v43, %v64_v42  ;;  %v139_v51 = vsel %vm61_vm0, %v120_v37, 0.0  ;;  %v69_v52 = vsel %vm61_vm0, %v43_v33, 0.0 }
   0xf   :  { %v141_v55 = vsel %vm61_vm0, %v119_v34, 0.0  ;;  %v52_v56 = vcombine.high %v50_v45, %v50_v45  ;;  %v71_v57 = vsel %vm61_vm0, %v51_v46, 0.0  ;;  %v143_v60 = vsel %vm61_vm0, %v121_v50, 0.0 }
  0x10   :  { %v136_v48 = vadd.f32 %v135_v38, %v134_v41  ;;  %v68_v54 = vadd.f32 %v67_v47, %v66_v49  ;;  %v73_v61 = vsel %vm61_vm0, %v50_v45, 0.0 }
  0x11   :  { %v75_v0 = vsel %vm61_vm0, %v52_v56, 0.0 }
  0x12   :  { %v138_v53 = vadd.f32 %v137_v44, %v136_v48  ;;  %v70_v59 = vadd.f32 %v69_v52, %v68_v54 }
  0x14   :  { %v140_v58 = vadd.f32 %v139_v51, %v138_v53  ;;  %v72_v63 = vadd.f32 %v71_v57, %v70_v59 }
  0x16   :  { %v142_v62 = vadd.f32 %v141_v55, %v140_v58  ;;  %v74_v2 = vadd.f32 %v73_v61, %v72_v63 }
  0x18   :  { %v144_v1 = vadd.f32 %v143_v60, %v142_v62  ;;  %v76_v3 = vadd.f32 %v75_v0, %v74_v2 }
  0x1a   :  { %145 = vadd.xlane.f32.xlu0 %v144_v1 }
  0x1e   :  { %77 = vadd.xlane.f32.xlu0 %v76_v3 }
  0xa3   :  { %v146_v4 = vpop.xlane.xlu0 %145 }
  0xa4   :  { %v147_v5 = vadd.f32 1.0, %v146_v4 }
  0xa6   :  { %157 = vrcp.f32 %v147_v5 }
  0xa7   :  { %v78_v6 = vpop.xlane.xlu0 %77 }
  0xa8   :  { %v79_v7 = vadd.f32 1.0, %v78_v6 }
  0xb3   :  { %v158_v8 = vpop.eup %157 }
  0xb4   :  { %v149_v9 = vmul.f32 %v158_v8, %v79_v7 }
  0xb6   :  { %v150_v10 = vsub.f32 1.0, %v149_v9 }
  0xb8   :  { %151 = vst [vmem:[%s208_s2] sm:$0x3] %v150_v10 }

</bundles_post_ra>
